<compile_context>
chip_gen: v7x
topology: tpu7x:2x2x1
jax: 0.10.0
libtpu: 0.0.40
codegen_flags: <defaults>
</compile_context>

<pallas_src>
import functools

import jax
import jax.numpy as jnp
from jax.experimental import pallas as pl
from jax.experimental.pallas import tpu as pltpu


# ---------------------------------------------------------------------------
# Small helpers
# ---------------------------------------------------------------------------
def _round_up(x, m):
    return ((x + m - 1) // m) * m


def _pad2d(a, rows, cols):
    r, c = a.shape
    if r == rows and c == cols:
        return a
    return jnp.pad(a, ((0, rows - r), (0, cols - c)))


# ---------------------------------------------------------------------------
# Generation-specific tiling / VMEM budgets
# ---------------------------------------------------------------------------
def _tpu_generation():
    try:
        kind = jax.devices()[0].device_kind.lower()
    except Exception:  # pragma: no cover - no devices visible
        return "unknown"
    if "v7" in kind:
        return "v7x"
    if "v6" in kind or "trillium" in kind:
        return "v6e"
    if "v5" in kind:
        return "v5e"
    return "unknown"


#                 tm_cap  feat_cap  vmem_limit_bytes  working-set budget
_GEN_CONFIG = {
    "v5e":     (1024, 2048, 100 * 2**20, 80 * 2**20),   # 128 MiB physical VMEM
    "v6e":     (1024, 2048, 100 * 2**20, 80 * 2**20),   # 128 MiB physical VMEM
    "v7x":     (1024, 1024,  48 * 2**20, 40 * 2**20),   # 64 MiB per TensorCore
    "unknown": ( 512, 1024,  48 * 2**20, 40 * 2**20),   # conservative default
}


def _feature_plan(in_dims, h_dims, gen):
    """Tile / padded extents for the two feature dims (batch-independent).

    Each feature dim is the contraction dim (K) of one layer and the output
    dim (N) of the other, so a single tile size is chosen per feature dim and
    shared by both kernels -- this lets the padded encoder output feed the
    decoder directly with no slice / re-pad pass.
    """
    tm_cap, feat_cap, vmem_limit, budget = _GEN_CONFIG[gen]
    t_in = min(feat_cap, _round_up(in_dims, 128))
    t_h = min(feat_cap, _round_up(h_dims, 128))

    def working_set(t_in_, t_h_):
        # Worst case over encoder ([tm, t_in] x [t_in, t_h]) and decoder
        # ([tm, t_h] x [t_h, t_in]).  x tiles stay f32 (cast in-kernel),
        # weights bf16, output f32; all BlockSpec tiles are double-buffered,
        # plus an f32 accumulator when the K axis ends up tiled.
        def one(tk, tn, k_tiled):
            ws = (2 * tm_cap * tk * 4        # x tiles (f32, double-buffered)
                  + 2 * tk * tn * 2          # weight tiles (bf16)
                  + 2 * tm_cap * tn * 4      # output tiles (f32)
                  + 2 * tn * 4)              # bias tile
            if k_tiled:
                ws += tm_cap * tn * 4        # accumulator scratch
            return ws

        enc = one(t_in_, t_h_, _round_up(in_dims, 128) > t_in_)
        dec = one(t_h_, t_in_, _round_up(h_dims, 128) > t_h_)
        return max(enc, dec)

    # Shrink feature tiles (128-aligned) until the working set fits the budget.
    while working_set(t_in, t_h) > budget and max(t_in, t_h) > 128:
        if t_h >= t_in and t_h > 128:
            t_h = max(128, _round_up(t_h // 2, 128))
        else:
            t_in = max(128, _round_up(t_in // 2, 128))

    if gen == "v7x":
        # Make sure each layer has >=2 blocks along its N ("parallel") axis so
        # both TensorCores get work even when the whole batch fits one tm tile.
        if _round_up(h_dims, 128) >= 256 and _round_up(h_dims, t_h) // t_h < 2:
            t_h = max(128, _round_up(_round_up(h_dims, 128) // 2, 128))
        if _round_up(in_dims, 128) >= 256 and _round_up(in_dims, t_in) // t_in < 2:
            t_in = max(128, _round_up(_round_up(in_dims, 128) // 2, 128))

    return dict(
        t_in=t_in, t_h=t_h,
        p_in=_round_up(in_dims, t_in), p_h=_round_up(h_dims, t_h),
        vmem_limit=vmem_limit,
    )


def _batch_plan(m, gen):
    tm_cap = _GEN_CONFIG[gen][0]
    tm = min(tm_cap, _round_up(m, 8))    # pad only to the sublane minimum when small
    pm = _round_up(m, tm)
    return tm, pm


# ---------------------------------------------------------------------------
# Kernels
# ---------------------------------------------------------------------------
def _epilogue(y, activation):
    if activation == "sigmoid":
        # sigmoid(y) = 1 / (1 + exp(-y)): exp on the EUP, approx reciprocal on
        # the EUP as well -- keeps the divide off the VALU in the epilogue.
        return pl.reciprocal(1.0 + jnp.exp(-y), approx=True)
    return jnp.tanh(y)


def _linear_act_kernel_fullk(x_ref, w_ref, b_ref, o_ref, *, activation, compute_dtype):
    """o = act(x @ w + b): full K resident -> no accumulator, no K grid axis."""
    x = x_ref[...].astype(compute_dtype)          # in-kernel cast (hidden under MXU)
    y = jnp.dot(x, w_ref[...], preferred_element_type=jnp.float32)
    y = y + b_ref[...]                            # bias broadcast [1, tn], f32
    o_ref[...] = _epilogue(y, activation).astype(o_ref.dtype)


def _linear_act_kernel_ktiled(x_ref, w_ref, b_ref, o_ref, acc_ref, *,
                              activation, compute_dtype):
    """Fallback for very large K: f32 VMEM accumulator with init/finalize."""
    k = pl.program_id(2)

    @pl.when(k == 0)
    def _():
        acc_ref[...] = jnp.zeros_like(acc_ref)

    acc_ref[...] += jnp.dot(
        x_ref[...].astype(compute_dtype), w_ref[...],
        preferred_element_type=jnp.float32,
    )

    @pl.when(k == pl.num_programs(2) - 1)
    def _():
        y = acc_ref[...] + b_ref[...]
        o_ref[...] = _epilogue(y, activation).astype(o_ref.dtype)


def _linear_act_padded(xp, wp, bp, *, tm, tk, tn, activation, compute_dtype,
                       vmem_limit):
    """act(xp @ wp + bp) on already-padded operands; returns the padded output."""
    pm, pk = xp.shape
    pk2, pn = wp.shape
    assert pk == pk2 and pm % tm == 0 and pk % tk == 0 and pn % tn == 0
    gm, gn, gk = pm // tm, pn // tn, pk // tk

    cost = pl.CostEstimate(
        flops=int(2 * pm * pk * pn),
        transcendentals=int(pm * pn),
        bytes_accessed=int(pm * pk * xp.dtype.itemsize
                           + pk * pn * wp.dtype.itemsize
                           + pm * pn * 4 + pn * 4),
    )

    if gk == 1:
        kernel = functools.partial(_linear_act_kernel_fullk,
                                   activation=activation,
                                   compute_dtype=compute_dtype)
        grid_spec = pltpu.PrefetchScalarGridSpec(
            num_scalar_prefetch=0,
            grid=(gm, gn),
            in_specs=[
                pl.BlockSpec((tm, tk), lambda i, j: (i, 0)),   # x tile (full K)
                pl.BlockSpec((tk, tn), lambda i, j: (0, j)),   # weight tile
                pl.BlockSpec((1, tn), lambda i, j: (0, j)),    # bias tile
            ],
            out_specs=pl.BlockSpec((tm, tn), lambda i, j: (i, j)),
        )
        dims = ("parallel", "parallel")
    else:
        kernel = functools.partial(_linear_act_kernel_ktiled,
                                   activation=activation,
                                   compute_dtype=compute_dtype)
        grid_spec = pltpu.PrefetchScalarGridSpec(
            num_scalar_prefetch=0,
            grid=(gm, gn, gk),
            in_specs=[
                pl.BlockSpec((tm, tk), lambda i, j, kk: (i, kk)),
                pl.BlockSpec((tk, tn), lambda i, j, kk: (kk, j)),
                pl.BlockSpec((1, tn), lambda i, j, kk: (0, j)),   # K-invariant
            ],
            out_specs=pl.BlockSpec((tm, tn), lambda i, j, kk: (i, j)),
            scratch_shapes=[pltpu.VMEM((tm, tn), jnp.float32)],
        )
        dims = ("parallel", "parallel", "arbitrary")

    return pl.pallas_call(
        kernel,
        out_shape=jax.ShapeDtypeStruct((pm, pn), jnp.float32),
        grid_spec=grid_spec,
        compiler_params=pltpu.CompilerParams(
            dimension_semantics=dims,
            vmem_limit_bytes=vmem_limit,
        ),
        cost_estimate=cost,
    )(xp, wp, bp)


# ---------------------------------------------------------------------------
# Parameter preparation (done ONCE, outside the per-call jit)
# ---------------------------------------------------------------------------
def prepare_params(w_enc, b_enc, w_dec, b_dec, *, compute_dtype=jnp.bfloat16):
    """Pad + cast the (static) weights/biases once.

    w_enc: [h_dims, in_dims] (PyTorch Linear layout), b_enc: [h_dims]
    w_dec: [in_dims, h_dims],                          b_dec: [in_dims]
    """
    h_dims, in_dims = w_enc.shape
    fp = _feature_plan(in_dims, h_dims, _tpu_generation())
    we_p = _pad2d(jnp.asarray(w_enc).T.astype(compute_dtype), fp["p_in"], fp["p_h"])
    be_p = _pad2d(jnp.asarray(b_enc, jnp.float32).reshape(1, -1), 1, fp["p_h"])
    wd_p = _pad2d(jnp.asarray(w_dec).T.astype(compute_dtype), fp["p_h"], fp["p_in"])
    bd_p = _pad2d(jnp.asarray(b_dec, jnp.float32).reshape(1, -1), 1, fp["p_in"])
    return we_p, be_p, wd_p, bd_p


# ---------------------------------------------------------------------------
# Public forward (mirrors SparseAutoencoder.forward)
# ---------------------------------------------------------------------------
@functools.partial(jax.jit,
                   static_argnames=("in_dims", "h_dims", "has_fids", "compute_dtype"))
def sparse_autoencoder_forward(x, we_p, be_p, wd_p, bd_p, *,
                               in_dims, h_dims, has_fids=False,
                               compute_dtype=jnp.bfloat16):
    """Pallas forward.  Returns (encoded, decoded) or (encoded, None).

    x:    [B, in_dims] f32 (kept f32 in HBM; cast to bf16 inside the kernel)
    we_p/be_p/wd_p/bd_p: outputs of prepare_params (padded, weights in bf16)
    has_fids: mirrors `fids is not None` -- the decoder kernel never launches.
    """
    m = x.shape[0]
    gen = _tpu_generation()
    fp = _feature_plan(in_dims, h_dims, gen)
    tm, pm = _batch_plan(m, gen)

    # Only the activations are padded per call (batch to sublane/tm, K to tile).
    xp = _pad2d(x, pm, fp["p_in"])

    enc_p = _linear_act_padded(
        xp, we_p, be_p, tm=tm, tk=fp["t_in"], tn=fp["t_h"],
        activation="sigmoid", compute_dtype=compute_dtype,
        vmem_limit=fp["vmem_limit"])
    encoded = enc_p[:m, :h_dims]
    if has_fids:
        return encoded, None

    # Feed the padded encoder output straight into the decoder: padded columns
    # hold sigmoid(0)=0.5 but hit all-zero padded K-rows of wd_p, so they
    # contribute nothing; padded batch rows are sliced off below.
    dec_p = _linear_act_padded(
        enc_p, wd_p, bd_p, tm=tm, tk=fp["t_h"], tn=fp["t_in"],
        activation="tanh", compute_dtype=compute_dtype,
        vmem_limit=fp["vmem_limit"])
    decoded = dec_p[:m, :in_dims]
    return encoded, decoded


# ---------------------------------------------------------------------------
# Init (xavier uniform + zero bias, matching the module __init__) + reference
# ---------------------------------------------------------------------------
def _xavier_uniform(key, fan_out, fan_in):
    limit = jnp.sqrt(6.0 / (fan_in + fan_out))
    return jax.random.uniform(key, (fan_out, fan_in), dtype=jnp.float32,
                              minval=-limit, maxval=limit)


def init_params(key, in_dims, h_dims):
    k_enc, k_dec = jax.random.split(key)
    w_enc = _xavier_uniform(k_enc, h_dims, in_dims)   # nn.Linear(in_dims, h_dims).weight
    b_enc = jnp.zeros((h_dims,), jnp.float32)
    w_dec = _xavier_uniform(k_dec, in_dims, h_dims)   # nn.Linear(h_dims, in_dims).weight
    b_dec = jnp.zeros((in_dims,), jnp.float32)
    return w_enc, b_enc, w_dec, b_dec


def reference_forward(x, w_enc, b_enc, w_dec, b_dec):
    enc = jax.nn.sigmoid(x @ w_enc.T + b_enc)
    dec = jnp.tanh(enc @ w_dec.T + b_dec)
    return enc, dec


# TODO(synk): sparsity_penalty / loss_function / neutralize_emb are training-time
# host helpers, not part of forward(); they are intentionally not kernelized.

if __name__ == "__main__":
    in_dims, h_dims = 32, 64
    batch = 8

    key = jax.random.PRNGKey(0)
    k_x, k_p = jax.random.split(key)
    x = jax.random.normal(k_x, (batch, in_dims), dtype=jnp.float32)
    w_enc, b_enc, w_dec, b_dec = init_params(k_p, in_dims, h_dims)

    # Weights padded + cast to bf16 once, outside the jitted forward.
    params = prepare_params(w_enc, b_enc, w_dec, b_dec)

    # Full path: encoder + decoder.
    encoded, decoded = sparse_autoencoder_forward(
        x, *params, in_dims=in_dims, h_dims=h_dims, has_fids=False)
    jax.block_until_ready((encoded, decoded))

    enc_ref, dec_ref = reference_forward(x, w_enc, b_enc, w_dec, b_dec)
    assert encoded.shape == (batch, h_dims) and decoded.shape == (batch, in_dims)
    # bf16 matmul operands + approx reciprocal -> relaxed tolerance vs f32 ref.
    assert float(jnp.max(jnp.abs(encoded - enc_ref))) < 2e-2
    assert float(jnp.max(jnp.abs(decoded - dec_ref))) < 2e-2

    # fids-not-None path: encoder only (decoder kernel never launched).
    enc_only, dec_none = sparse_autoencoder_forward(
        x, *params, in_dims=in_dims, h_dims=h_dims, has_fids=True)
    jax.block_until_ready(enc_only)
    assert dec_none is None
    assert float(jnp.max(jnp.abs(enc_only - enc_ref))) < 2e-2

    print("KERNEL_OK")
</pallas_src>

<mosaic_0001>
module attributes {stable_mosaic.version = 11 : i64} {
  func.func @_linear_act_kernel_fullk(%arg0: i32, %arg1: i32, %arg2: memref<8x128xf32, #tpu.memory_space<vmem>>, %arg3: memref<128x128xbf16, #tpu.memory_space<vmem>>, %arg4: memref<1x128xf32, #tpu.memory_space<vmem>>, %arg5: memref<8x128xf32, #tpu.memory_space<vmem>>) attributes {dimension_semantics = [#tpu.dimension_semantics<parallel>, #tpu.dimension_semantics<parallel>], iteration_bounds = array<i64: 1, 1>, scalar_prefetch = 0 : i64, scratch_operands = 0 : i64, tpu.core_type = #tpu.core_type<tc>, window_params = [{transform_indices = @transform_0, window_bounds = array<i64: 8, 128>}, {transform_indices = @transform_1, window_bounds = array<i64: 128, 128>}, {transform_indices = @transform_2, window_bounds = array<i64: 1, 128>}, {transform_indices = @transform_3, window_bounds = array<i64: 8, 128>}]} {
    %c0 = arith.constant 0 : index
    %c0_0 = arith.constant 0 : index
    %0 = vector.load %arg2[%c0, %c0_0] : memref<8x128xf32, #tpu.memory_space<vmem>>, vector<8x128xf32>
    %1 = arith.truncf %0 : vector<8x128xf32> to vector<8x128xbf16>
    %c0_1 = arith.constant 0 : index
    %c0_2 = arith.constant 0 : index
    %2 = vector.load %arg3[%c0_1, %c0_2] : memref<128x128xbf16, #tpu.memory_space<vmem>>, vector<128x128xbf16>
    %cst = arith.constant dense<0.000000e+00> : vector<8x128xf32>
    %3 = tpu.matmul %1, %2, %cst {dimension_numbers = #tpu.dot_dimension_numbers<[1], [0], [0], [1], [0, 0, 1, 1], [], []>} : vector<8x128xbf16>, vector<128x128xbf16>, vector<8x128xf32> -> vector<8x128xf32>
    %c0_3 = arith.constant 0 : index
    %c0_4 = arith.constant 0 : index
    %4 = vector.load %arg4[%c0_3, %c0_4] : memref<1x128xf32, #tpu.memory_space<vmem>>, vector<1x128xf32>
    %5 = vector.broadcast %4 : vector<1x128xf32> to vector<8x128xf32>
    %6 = arith.addf %3, %5 : vector<8x128xf32>
    %7 = math.tanh %6 : vector<8x128xf32>
    %c0_5 = arith.constant 0 : index
    %c0_6 = arith.constant 0 : index
    %8 = vector.load %arg5[%c0_5, %c0_6] : memref<8x128xf32, #tpu.memory_space<vmem>>, vector<8x128xf32>
    tpu.vector_store %arg5[%c0_5, %c0_6], %7 {strides = array<i32>} : memref<8x128xf32, #tpu.memory_space<vmem>>, vector<8x128xf32>,
    return
  }
  func.func @transform_0(%arg0: i32, %arg1: i32) -> (i32, i32) {
    %c0_i32 = arith.constant 0 : i32
    %c0_i32_0 = arith.constant 0 : i32
    return %arg0, %c0_i32 : i32, i32
  }
  func.func @transform_1(%arg0: i32, %arg1: i32) -> (i32, i32) {
    %c0_i32 = arith.constant 0 : i32
    %c0_i32_0 = arith.constant 0 : i32
    return %c0_i32, %arg1 : i32, i32
  }
  func.func @transform_2(%arg0: i32, %arg1: i32) -> (i32, i32) {
    %c0_i32 = arith.constant 0 : i32
    %c0_i32_0 = arith.constant 0 : i32
    return %c0_i32, %arg1 : i32, i32
  }
  func.func @transform_3(%arg0: i32, %arg1: i32) -> (i32, i32) {
    %c0_i32 = arith.constant 0 : i32
    return %arg0, %arg1 : i32, i32
  }
}

module attributes {stable_mosaic.version = 11 : i64} {
  func.func @_linear_act_kernel_fullk(%arg0: i32, %arg1: i32, %arg2: memref<8x128xf32, #tpu.memory_space<vmem>>, %arg3: memref<128x128xbf16, #tpu.memory_space<vmem>>, %arg4: memref<1x128xf32, #tpu.memory_space<vmem>>, %arg5: memref<8x128xf32, #tpu.memory_space<vmem>>) attributes {dimension_semantics = [#tpu.dimension_semantics<parallel>, #tpu.dimension_semantics<parallel>], iteration_bounds = array<i64: 1, 1>, scalar_prefetch = 0 : i64, scratch_operands = 0 : i64, tpu.core_type = #tpu.core_type<tc>, window_params = [{transform_indices = @transform_0, window_bounds = array<i64: 8, 128>}, {transform_indices = @transform_1, window_bounds = array<i64: 128, 128>}, {transform_indices = @transform_2, window_bounds = array<i64: 1, 128>}, {transform_indices = @transform_3, window_bounds = array<i64: 8, 128>}]} {
    %c0 = arith.constant 0 : index
    %c0_0 = arith.constant 0 : index
    %0 = vector.load %arg2[%c0, %c0_0] : memref<8x128xf32, #tpu.memory_space<vmem>>, vector<8x128xf32>
    %1 = arith.truncf %0 : vector<8x128xf32> to vector<8x128xbf16>
    %c0_1 = arith.constant 0 : index
    %c0_2 = arith.constant 0 : index
    %2 = vector.load %arg3[%c0_1, %c0_2] : memref<128x128xbf16, #tpu.memory_space<vmem>>, vector<128x128xbf16>
    %cst = arith.constant dense<0.000000e+00> : vector<8x128xf32>
    %3 = tpu.matmul %1, %2, %cst {dimension_numbers = #tpu.dot_dimension_numbers<[1], [0], [0], [1], [0, 0, 1, 1], [], []>} : vector<8x128xbf16>, vector<128x128xbf16>, vector<8x128xf32> -> vector<8x128xf32>
    %c0_3 = arith.constant 0 : index
    %c0_4 = arith.constant 0 : index
    %4 = vector.load %arg4[%c0_3, %c0_4] : memref<1x128xf32, #tpu.memory_space<vmem>>, vector<1x128xf32>
    %5 = vector.broadcast %4 : vector<1x128xf32> to vector<8x128xf32>
    %6 = arith.addf %3, %5 : vector<8x128xf32>
    %cst_5 = arith.constant 0.000000e+00 : f32
    %7 = vector.broadcast %cst_5 : f32 to vector<8x128xf32>
    %8 = arith.subf %7, %6 : vector<8x128xf32>
    %9 = math.exp %8 : vector<8x128xf32>
    %cst_6 = arith.constant 1.000000e+00 : f32
    %10 = vector.broadcast %cst_6 : f32 to vector<8x128xf32>
    %11 = arith.addf %10, %9 : vector<8x128xf32>
    %12 = tpu.reciprocal %11 {approx = true} : vector<8x128xf32> -> vector<8x128xf32>
    %c0_7 = arith.constant 0 : index
    %c0_8 = arith.constant 0 : index
    %13 = vector.load %arg5[%c0_7, %c0_8] : memref<8x128xf32, #tpu.memory_space<vmem>>, vector<8x128xf32>
    tpu.vector_store %arg5[%c0_7, %c0_8], %12 {strides = array<i32>} : memref<8x128xf32, #tpu.memory_space<vmem>>, vector<8x128xf32>,
    return
  }
  func.func @transform_0(%arg0: i32, %arg1: i32) -> (i32, i32) {
    %c0_i32 = arith.constant 0 : i32
    %c0_i32_0 = arith.constant 0 : i32
    return %arg0, %c0_i32 : i32, i32
  }
  func.func @transform_1(%arg0: i32, %arg1: i32) -> (i32, i32) {
    %c0_i32 = arith.constant 0 : i32
    %c0_i32_0 = arith.constant 0 : i32
    return %c0_i32, %arg1 : i32, i32
  }
  func.func @transform_2(%arg0: i32, %arg1: i32) -> (i32, i32) {
    %c0_i32 = arith.constant 0 : i32
    %c0_i32_0 = arith.constant 0 : i32
    return %c0_i32, %arg1 : i32, i32
  }
  func.func @transform_3(%arg0: i32, %arg1: i32) -> (i32, i32) {
    %c0_i32 = arith.constant 0 : i32
    return %arg0, %arg1 : i32, i32
  }
}

</mosaic_0001>

<bundles_post_ra>
// kernel: sparse_autoencoder_forward.2
= control target key start
LH: loop header
LB: loop body
LE: loop exit
PB: predicated region body
PF: predicated region fallthrough
CT: control target
= control target key end

     0   :  { %8 = vsyncpa [#allocation3], 0  ;;  %s326_s0 = inlined_call_operand.vmem [shape: f32[8,128], index: 0, kind: input, shape index: {}]   ;;  %s327_s1 = inlined_call_operand.hbm [shape: bf16[128,128], index: 1, kind: input, shape index: {}]   ;;  %s328_s2 = inlined_call_operand.hbm [shape: f32[1,128], index: 2, kind: input, shape index: {}]   ;;  %s329_s3 = inlined_call_operand.vmem [shape: f32[8,128], index: 3, kind: output, shape index: {}]  }
   0x1   :  { %9 = vsyncpa [#allocation5], 0  ;;  %s270_s12 = smov [#allocation2]   ;;  %s222_s16 = scalar_lea.hbm %s327_s1, 1024 }
   0x2   :  { %s17_s13 = sshll.u32 %s270_s12, 4  ;;  %p223_p0 = scmp.ne.s32.totalorder %s327_s1, %s222_s16  ;;  %s18_s13 = int_to_ptr.vmem [resolvable:$true] %s17_s13 }
   0x3   :  { %p226_p1 = scmp.lt.u32.totalorder %s222_s16, %s327_s1 }
   0x5   :  { %p228_p2 = pnand %p226_p1, %p223_p0 }
   0x7   :  { %231 = shalt.err (!%p228_p2)
}
   0x8   :  { %s232_s21 = scalar_lea.vmem %s18_s13, 1024  ;;  %p237_p4 = scmp.lt.s32.totalorder %s18_s13, %s18_s13 }
   0x9   :  { %p233_p3 = scmp.ne.s32.totalorder %s18_s13, %s232_s21  ;;  %p238_p5 = scmp.lt.s32.totalorder %s232_s21, %s232_s21 }
   0xb   :  { %p239_p6 = por %p238_p5, %p237_p4 }
   0xd   :  { %p240_p7 = pnand %p239_p6, %p233_p3 }
   0xf   :  { %243 = shalt.err (!%p240_p7)
}
  0x10   :  { %s271_s22 = smov 64   ;;  %s272_s23 = smov 4  }
  0x11   :  { %23 = dma.hbm_to_vmem [thread:$0]  %s327_s1, 1024, %s18_s13, [#allocation3], %s271_s22, %s271_s22, %s272_s23  }
  0x12   :  { %s273_s26 = smov [#allocation4]   ;;  %s244_s30 = scalar_lea.hbm %s328_s2, 16 }
  0x13   :  { %s30_s27 = sshll.u32 %s273_s26, 4  ;;  %p245_p8 = scmp.ne.s32.totalorder %s328_s2, %s244_s30  ;;  %s31_s27 = int_to_ptr.vmem [resolvable:$true] %s30_s27 }
  0x14   :  { %p248_p9 = scmp.lt.u32.totalorder %s244_s30, %s328_s2 }
  0x16   :  { %p250_p10 = pnand %p248_p9, %p245_p8 }
  0x18   :  { %253 = shalt.err (!%p250_p10)
}
  0x19   :  { %s254_s8 = scalar_lea.vmem %s31_s27, 16  ;;  %s258_s1 = scalar_lea.vmem %s31_s27, 32 }
  0x1a   :  { %p255_p11 = scmp.ne.s32.totalorder %s31_s27, %s254_s8  ;;  %p259_p12 = scmp.lt.s32.totalorder %s31_s27, %s31_s27 }
  0x1b   :  { %p260_p13 = scmp.lt.s32.totalorder %s258_s1, %s254_s8 }
  0x1d   :  { %p261_p0 = por %p260_p13, %p259_p12 }
  0x1f   :  { %p262_p1 = pnand %p261_p0, %p255_p11 }
  0x21   :  { %265 = shalt.err (!%p262_p1)
}
  0x22   :  { %33 = dma.hbm_to_vmem [thread:$0]  %s328_s2, 16, %s31_s27, [#allocation5]  }
  0x23   :  { %266 = dma.done.wait [#allocation3], 1024  }
  0x24   :  { %267 = vsyncadd [#allocation3], 4294966272 }
  0x25   :  { %268 = dma.done.wait [#allocation5], 16  }
  0x26   :  { %269 = vsyncadd [#allocation5], 4294967280  ;;  %v274_v0 = vmov 0.0   ;;  %vm275_vm0 = vmmov 0   ;;  %v210_v1 = vld [vmem:[#allocation2] sm:$0xff]   ;;  %v211_v2 = vld [vmem:[#allocation2 + $0x8] sm:$0xff]  }
  0x27   :  { %184 = vmatprep.subr.bf16.mxu0 %v274_v0  ;;  %200 = vmatprep.mubr.msk.bf16.mxu0 %vm275_vm0, %v274_v0  ;;  %v212_v3 = vld [vmem:[#allocation2 + $0x10] sm:$0xff]   ;;  %v213_v4 = vld [vmem:[#allocation2 + $0x18] sm:$0xff]   ;;  %v214_v5 = vld [vmem:[#allocation2 + $0x20] sm:$0xff]  }
  0x28   :  { %185 = vmatpush3.bf16.msra.mxu0 %v210_v1  ;;  %v215_v6 = vld [vmem:[#allocation2 + $0x28] sm:$0xff]   ;;  %v216_v7 = vld [vmem:[#allocation2 + $0x30] sm:$0xff]   ;;  %v217_v8 = vld [vmem:[#allocation2 + $0x38] sm:$0xff]  }
  0x29   :  { %186 = vmatprep.subr.bf16.mxu0 %v274_v0  ;;  %v41_v9 = vld [vmem:[%s326_s0] sm:$0xff] }
  0x2a   :  { %v42_v10 = vpack.c.bf16 %v41_v9, %v41_v9  ;;  %v166_v11 = vld [vmem:[#allocation4] ss:$0 sm:$0xff] }
  0x2c   :  { %187 = vmatpush3.bf16.msra.mxu0 %v211_v2 }
  0x2d   :  { %188 = vmatprep.subr.bf16.mxu0 %v274_v0 }
  0x30   :  { %189 = vmatpush3.bf16.msra.mxu0 %v212_v3 }
  0x31   :  { %190 = vmatprep.subr.bf16.mxu0 %v274_v0 }
  0x34   :  { %191 = vmatpush3.bf16.msra.mxu0 %v213_v4 }
  0x35   :  { %192 = vmatprep.subr.bf16.mxu0 %v274_v0 }
  0x38   :  { %193 = vmatpush3.bf16.msra.mxu0 %v214_v5 }
  0x39   :  { %194 = vmatprep.subr.bf16.mxu0 %v274_v0 }
  0x3c   :  { %195 = vmatpush3.bf16.msra.mxu0 %v215_v6 }
  0x3d   :  { %196 = vmatprep.subr.bf16.mxu0 %v274_v0 }
  0x40   :  { %197 = vmatpush3.bf16.msra.mxu0 %v216_v7 }
  0x41   :  { %198 = vmatprep.subr.bf16.mxu0 %v274_v0 }
  0x44   :  { %199 = vmatpush3.bf16.msra.mxu0 %v217_v8 }
  0x47   :  { %201 = vmatmul.mubr.bf16.vlgmr.msra.gmra.mrb[0].mxu0 %v42_v10 }
 0x11a   :  { %v148_v12 = vpop.f32.mrb[0].mxu0 }
 0x11b   :  { %v149_v13 = vadd.f32 %v166_v11, %v148_v12  ;;  %v202_v14 = vpop.f32.mrb[1].mxu0 }
 0x11c   :  { %v151_v15 = vpop.f32.mrb[2].mxu0 }
 0x11d   :  { %v154_v16 = vsub.f32 0.0, %v149_v13  ;;  %v203_v17 = vpop.f32.mrb[3].mxu0 }
 0x11f   :  { %v155_v18 = vmul.f32 1.442695, %v154_v16 }
 0x121   :  { %218 = vpow2.f32 %v155_v18 }
 0x12b   :  { %v219_v19 = vpop.eup %218 }
 0x12c   :  { %v157_v20 = vadd.f32 1.0, %v219_v19 }
 0x12e   :  { %220 = vrcp.f32 %v157_v20 }
 0x138   :  { %v221_v21 = vpop.eup %220 }
 0x139   :  { %159 = vst [vmem:[%s329_s3] sm:$0xff] %v221_v21 }
 0x13a   :  { %164 = vsyncpa [#allocation3], 1 }
 0x13b   :  { %165 = vsyncpa [#allocation5], 1 }

// kernel: sparse_autoencoder_forward.3
= control target key start
LH: loop header
LB: loop body
LE: loop exit
PB: predicated region body
PF: predicated region fallthrough
CT: control target
= control target key end

     0   :  { %v220_v1 = vmov 0.0   ;;  %vm221_vm0 = vmmov 0   ;;  %s285_s0 = inlined_call_operand.vmem [shape: f32[8,128], index: 0, kind: input, shape index: {}]   ;;  %s286_s1 = inlined_call_operand.vmem [shape: bf16[128,128], index: 1, kind: input, shape index: {}]   ;;  %s287_s2 = inlined_call_operand.vmem [shape: f32[1,128], index: 2, kind: input, shape index: {}]   ;;  %s288_s3 = inlined_call_operand.hbm [shape: f32[8,128], index: 3, kind: output, shape index: {}]  }
   0x1   :  { %v186_v0 = vld [vmem:[%s286_s1] sm:$0xff]   ;;  %163 = vmatprep.subr.bf16.mxu0 %v220_v1  ;;  %v187_v2 = vld [vmem:[%s286_s1 + $0x8] sm:$0xff]   ;;  %179 = vmatprep.mubr.msk.bf16.mxu0 %vm221_vm0, %v220_v1  ;;  %v188_v3 = vld [vmem:[%s286_s1 + $0x10] sm:$0xff]  }
   0x2   :  { %164 = vmatpush3.bf16.msra.mxu0 %v186_v0 }
   0x3   :  { %165 = vmatprep.subr.bf16.mxu0 %v220_v1 }
   0x6   :  { %166 = vmatpush3.bf16.msra.mxu0 %v187_v2 }
   0x7   :  { %167 = vmatprep.subr.bf16.mxu0 %v220_v1 }
   0x8   :  { %8 = vsyncpa [#allocation3], 0  ;;  %v189_v4 = vld [vmem:[%s286_s1 + $0x18] sm:$0xff]   ;;  %v190_v5 = vld [vmem:[%s286_s1 + $0x20] sm:$0xff]   ;;  %s222_s5 = smov [#allocation2]  }
   0x9   :  { %v191_v6 = vld [vmem:[%s286_s1 + $0x28] sm:$0xff]   ;;  %v192_v7 = vld [vmem:[%s286_s1 + $0x30] sm:$0xff]   ;;  %v193_v8 = vld [vmem:[%s286_s1 + $0x38] sm:$0xff]   ;;  %s137_s1 = sshll.u32 %s222_s5, 4  ;;  %s138_s1 = int_to_ptr.vmem [resolvable:$true] %s137_s1 }
   0xa   :  { %168 = vmatpush3.bf16.msra.mxu0 %v188_v3  ;;  %v16_v9 = vld [vmem:[%s285_s0] sm:$0xff]  ;;  %s196_s0 = scalar_lea.vmem %s138_s1, 128  ;;  %p201_p1 = scmp.lt.s32.totalorder %s138_s1, %s138_s1 }
   0xb   :  { %169 = vmatprep.subr.bf16.mxu0 %v220_v1  ;;  %v17_v10 = vpack.c.bf16 %v16_v9, %v16_v9  ;;  %v145_v11 = vld [vmem:[%s287_s2] ss:$0 sm:$0xff]  ;;  %p197_p0 = scmp.ne.s32.totalorder %s138_s1, %s196_s0  ;;  %p202_p2 = scmp.lt.s32.totalorder %s196_s0, %s196_s0 }
   0xd   :  { %p203_p3 = por %p202_p2, %p201_p1 }
   0xe   :  { %170 = vmatpush3.bf16.msra.mxu0 %v189_v4 }
   0xf   :  { %171 = vmatprep.subr.bf16.mxu0 %v220_v1  ;;  %p204_p4 = pnand %p203_p3, %p197_p0 }
  0x12   :  { %172 = vmatpush3.bf16.msra.mxu0 %v190_v5 }
  0x13   :  { %173 = vmatprep.subr.bf16.mxu0 %v220_v1 }
  0x16   :  { %174 = vmatpush3.bf16.msra.mxu0 %v191_v6 }
  0x17   :  { %175 = vmatprep.subr.bf16.mxu0 %v220_v1 }
  0x1a   :  { %176 = vmatpush3.bf16.msra.mxu0 %v192_v7 }
  0x1b   :  { %177 = vmatprep.subr.bf16.mxu0 %v220_v1 }
  0x1e   :  { %178 = vmatpush3.bf16.msra.mxu0 %v193_v8 }
  0x21   :  { %180 = vmatmul.mubr.bf16.vlgmr.msra.gmra.mrb[0].mxu0 %v17_v10 }
  0xf4   :  { %v123_v12 = vpop.f32.mrb[0].mxu0 }
  0xf5   :  { %v124_v13 = vadd.f32 %v145_v11, %v123_v12  ;;  %v181_v14 = vpop.f32.mrb[1].mxu0 }
  0xf6   :  { %v126_v15 = vpop.f32.mrb[2].mxu0 }
  0xf7   :  { %194 = vtanh.f32 %v124_v13  ;;  %v182_v16 = vpop.f32.mrb[3].mxu0 }
 0x101   :  { %v195_v17 = vpop.eup %194 }
 0x102   :  { %130 = vst [vmem:[#allocation2] sm:$0xff] %v195_v17 }
 0x103   :  { %207 = shalt.err (!%p204_p4)
}
 0x104   :  { %s208_s7 = scalar_lea.hbm %s288_s3, 128 }
 0x105   :  { %p209_p5 = scmp.ne.s32.totalorder %s288_s3, %s208_s7  ;;  %p212_p6 = scmp.lt.u32.totalorder %s208_s7, %s288_s3 }
 0x107   :  { %p214_p7 = pnand %p212_p6, %p209_p5 }
 0x109   :  { %217 = shalt.err (!%p214_p7)
}
 0x10a   :  { %140 = dma.vmem_to_hbm [thread:$0]  %s138_s1, 128, %s288_s3, [#allocation3]  }
 0x10b   :  { %218 = dma.done.wait [#allocation3], 128  }
 0x10c   :  { %219 = vsyncadd [#allocation3], 4294967168 }
 0x10d   :  { %144 = vsyncpa [#allocation3], 1 }

</bundles_post_ra>
